<compile_context>
chip_gen: v5e
topology: v5e:2x2
jax: 0.10.0
libtpu: 0.0.40
codegen_flags: <defaults>
</compile_context>

<pallas_src>
import functools

import jax
import jax.numpy as jnp
from jax.experimental import pallas as pl
from jax.experimental.pallas import tpu as pltpu


def _round_up(x, m):
    return (x + m - 1) // m * m


# ----------------------------------------------------------------------------
# Pallas kernel: one detection level, tiled over (batch, spatial).
# ----------------------------------------------------------------------------
def _idetect_level_kernel(x_ref, w_ref, col_ref, raw_ref, dec_ref, *, nx, tl):
    # x_ref:   (1, C, TL)     f32 input features, spatial on the lane axis
    # w_ref:   (Npad, C)      bf16 1x1-conv weight (rows zero-padded to Npad)
    # col_ref: (Npad, 8)      f32 per-output-channel constants:
    #                         [scale, shift, s1, s2, cx, cy, c0, 0]
    # raw_ref: (1, Npad, TL)  bf16 "training" tensor x[i] (pre-sigmoid)
    # dec_ref: (1, Npad, TL)  f32  decoded boxes / scores
    l = pl.program_id(1)

    # Cast the activation tile to bf16 in-register (rides on idle VALU slots)
    # and run the 1x1 conv as W @ X on the MXU with f32 accumulation.
    x_bf = x_ref[0].astype(jnp.bfloat16)
    acc = jnp.dot(w_ref[...], x_bf, preferred_element_type=jnp.float32)

    col = col_ref[...]
    scale, shift = col[:, 0:1], col[:, 1:2]
    s1, s2 = col[:, 2:3], col[:, 3:4]
    cx, cy, c0 = col[:, 4:5], col[:, 5:6], col[:, 6:7]

    # ImplicitA / conv bias / ImplicitM all folded into scale & shift.
    raw = acc * scale + shift
    raw_ref[0] = raw.astype(raw_ref.dtype)     # bf16 store: halves raw traffic

    # sigmoid = 1 / (1 + exp(-raw)); exp and approx reciprocal both on the EUP.
    y = pl.reciprocal(1.0 + jnp.exp(-raw), approx=True)

    # Grid coords from an in-kernel iota.  Float formulation is exact for
    # S < ~2^22 (typical heads are orders of magnitude below that).
    lane = jax.lax.broadcasted_iota(jnp.int32, (1, tl), 1).astype(jnp.float32)
    idx = lane + (l * tl).astype(jnp.float32)          # flat spatial index
    gy = jnp.floor((idx + 0.5) * (1.0 / nx))
    gx = idx - gy * nx
    dec_ref[0] = y * s1 + (y * y) * s2 + gx * cx + gy * cy + c0


def idetect_level(x_nchw, ia, w, b, im, anchors_lvl, stride, na, no,
                  tl_max=2048, vmem_budget_bytes=40 * 1024 * 1024):
    """Run one detection level through the Pallas kernel.

    x_nchw:      (bs, C, ny, nx) float32
    ia:          (C,)            ImplicitA
    w:           (N, C)          conv1x1 weight (PyTorch layout, N = na*no)
    b:           (N,)            conv bias
    im:          (N,)            ImplicitM
    anchors_lvl: (na, 2)
    Returns (x_out (bs, na, ny, nx, no), z (bs, na*ny*nx, no)).
    """
    bs, C, ny, nx = x_nchw.shape
    N = na * no
    S = ny * nx
    # Multiple of 16 -> clean bf16 sublane packing for the resident weight.
    Npad = _round_up(N, 16)

    # Spatial (lane) tile: as large as the budget allows, multiple of 128 when
    # S >= 128 so every store is an unmasked lane-dense vst.  The last tile may
    # be partial; Pallas clamps the edge DMA (no host-side padding needed).
    tl_max = max(128, (tl_max // 128) * 128)
    if S < 128:
        tl = S
    else:
        tl = min(tl_max, (S // 128) * 128)

    def _vmem_bytes(t):
        x_blk = C * t * 4            # f32 activation tile
        raw_blk = Npad * t * 2       # bf16 raw tile
        dec_blk = Npad * t * 4       # f32 decode tile
        resident = Npad * C * 2 + Npad * 8 * 4
        return 2 * (x_blk + raw_blk + dec_blk) + 2 * resident

    while S >= 128 and tl > 128 and _vmem_bytes(tl) > vmem_budget_bytes:
        tl = max(128, (tl // 2 // 128) * 128)

    # Right-sized scoped-VMEM request (v7x only has 64 MiB per TensorCore).
    vmem_limit = int(min(_vmem_bytes(tl) + (8 << 20), 120 << 20))

    # NCHW -> (bs, C, S) is a free reshape (no transpose, no pad, no cast).
    x3 = x_nchw.reshape(bs, C, S)

    w_f32 = w.astype(jnp.float32)
    ia_f32 = ia.astype(jnp.float32)
    b_f32 = b.astype(jnp.float32)
    im_f32 = im.astype(jnp.float32)

    # Fold ImplicitA / bias / ImplicitM:
    #   raw = ((W @ (x + ia)) + b) * im = (W @ x) * im + ((W @ ia) + b) * im
    scale = im_f32
    shift = (w_f32 @ ia_f32 + b_f32) * im_f32

    # Per-output-channel decode polynomial coefficients.
    c_idx = jnp.arange(N) % no
    a_idx = jnp.arange(N) // no
    isx = (c_idx == 0).astype(jnp.float32)
    isy = (c_idx == 1).astype(jnp.float32)
    iswh = ((c_idx == 2) | (c_idx == 3)).astype(jnp.float32)
    anc = jnp.where(c_idx == 2, anchors_lvl[a_idx, 0],
                    jnp.where(c_idx == 3, anchors_lvl[a_idx, 1], 0.0))
    isxy = isx + isy
    s = jnp.float32(stride)
    s1 = 2.0 * s * isxy + (1.0 - isxy - iswh)
    s2 = 4.0 * anc * iswh
    cx = s * isx
    cy = s * isy
    c0 = -0.5 * s * isxy
    col = jnp.stack([scale, shift, s1, s2, cx, cy, c0,
                     jnp.zeros((N,), jnp.float32)], axis=1)          # (N, 8)
    if Npad != N:
        col = jnp.pad(col, ((0, Npad - N), (0, 0)))
        w_pad = jnp.pad(w_f32, ((0, Npad - N), (0, 0)))
    else:
        w_pad = w_f32
    w_bf16 = w_pad.astype(jnp.bfloat16)                              # (Npad, C)

    # NOTE: weight/col have constant index_maps, so Pallas only DMAs them once;
    # pl.Buffered(1) could drop their second VMEM buffer but saves < 1 MiB.
    kernel = functools.partial(_idetect_level_kernel, nx=float(nx), tl=tl)
    raw_p, dec_p = pl.pallas_call(
        kernel,
        out_shape=(jax.ShapeDtypeStruct((bs, Npad, S), jnp.bfloat16),
                   jax.ShapeDtypeStruct((bs, Npad, S), jnp.float32)),
        grid_spec=pltpu.PrefetchScalarGridSpec(
            num_scalar_prefetch=0,
            grid=(bs, pl.cdiv(S, tl)),
            in_specs=[
                pl.BlockSpec((1, C, tl), lambda bi, li: (bi, 0, li)),   # x
                pl.BlockSpec((Npad, C), lambda bi, li: (0, 0)),         # weight
                pl.BlockSpec((Npad, 8), lambda bi, li: (0, 0)),         # constants
            ],
            out_specs=(pl.BlockSpec((1, Npad, tl), lambda bi, li: (bi, 0, li)),
                       pl.BlockSpec((1, Npad, tl), lambda bi, li: (bi, 0, li))),
        ),
        compiler_params=pltpu.CompilerParams(
            dimension_semantics=("parallel", "parallel"),
            vmem_limit_bytes=vmem_limit),
    )(x3, w_bf16, col)

    # Layout change required by the module contract:
    #   (bs, N, ny*nx) -> (bs, na, ny, nx, no)
    # Only the channel slice + permute remains; raw is read back as bf16 (half
    # the bytes) with the f32 convert fused into the transpose.
    # TODO(synk): when the caller never uses x[i] (pure inference), skip the
    # raw output entirely (~1.8x on the kernel's HBM writes).
    raw5 = jnp.transpose(raw_p[:, :N, :].reshape(bs, na, no, ny, nx),
                         (0, 1, 3, 4, 2)).astype(jnp.float32)
    dec5 = jnp.transpose(dec_p[:, :N, :].reshape(bs, na, no, ny, nx),
                         (0, 1, 3, 4, 2))
    z = dec5.reshape(bs, na * ny * nx, no)
    return raw5, z


def idetect_forward(xs, params, anchors, strides, na, no):
    """Inference-mode IDetect.forward: returns (cat(z, 1), [x_i])."""
    # TODO(synk): training-mode branch and cached-grid buffer mutation are host
    # Python control flow in the original module; only inference is kerneled.
    # TODO(synk): the per-level pallas_calls could be fused into one dispatch
    # (scalar-prefetched per-level stride/nx/channel metadata in SMEM) to
    # amortize launch + glue cost, which dominates the small levels on v7x.
    x_outs, zs = [], []
    for i, x in enumerate(xs):
        p = params[i]
        raw5, z = idetect_level(x, p["ia"], p["w"], p["b"], p["im"],
                                anchors[i], strides[i], na, no)
        x_outs.append(raw5)
        zs.append(z)
    return jnp.concatenate(zs, axis=1), x_outs


# ----------------------------------------------------------------------------
# Pure-JAX f32 reference (mirrors the PyTorch forward) for a correctness check.
# ----------------------------------------------------------------------------
def reference_level(x, ia, w, b, im, anchors_lvl, stride, na, no):
    bs, C, ny, nx = x.shape
    N = na * no
    xa = x + ia.reshape(1, C, 1, 1)
    out = jnp.einsum("bchw,oc->bohw", xa, w) + b.reshape(1, N, 1, 1)
    out = out * im.reshape(1, N, 1, 1)
    raw5 = out.reshape(bs, na, no, ny, nx).transpose(0, 1, 3, 4, 2)
    y = jax.nn.sigmoid(raw5)
    yv, xv = jnp.meshgrid(jnp.arange(ny, dtype=jnp.float32),
                          jnp.arange(nx, dtype=jnp.float32), indexing="ij")
    grid = jnp.stack([xv, yv], axis=-1).reshape(1, 1, ny, nx, 2)
    xy = (y[..., 0:2] * 2.0 - 0.5 + grid) * stride
    wh = (y[..., 2:4] * 2.0) ** 2 * anchors_lvl.reshape(1, na, 1, 1, 2)
    yd = jnp.concatenate([xy, wh, y[..., 4:]], axis=-1)
    return raw5, yd.reshape(bs, -1, no)


if __name__ == "__main__":
    # Small synthetic config: nc=3 classes -> no=8, nl=2 levels, na=2 anchors
    # per level, neck channels [8, 16], strides [8, 16].
    nc = 3
    no = nc + 5
    anchors_list = [[10.0, 13.0, 16.0, 30.0], [30.0, 61.0, 62.0, 45.0]]
    nl = len(anchors_list)
    na = len(anchors_list[0]) // 2
    anchors = jnp.asarray(anchors_list, dtype=jnp.float32).reshape(nl, na, 2)
    strides = [8.0, 16.0]
    ch = [8, 16]
    N = na * no

    key = jax.random.PRNGKey(0)
    keys = jax.random.split(key, 4 * nl + nl)

    # Deterministic parameter init (shapes from IDetect.__init__ / Implicit{A,M}).
    params = []
    for i, c in enumerate(ch):
        k_w, k_b, k_ia, k_im = keys[4 * i:4 * i + 4]
        params.append({
            "w": jax.random.normal(k_w, (N, c), dtype=jnp.float32) * 0.05,
            "b": jax.random.normal(k_b, (N,), dtype=jnp.float32) * 0.05,
            "ia": jax.random.normal(k_ia, (c,), dtype=jnp.float32) * 0.02,
            "im": 1.0 + jax.random.normal(k_im, (N,), dtype=jnp.float32) * 0.02,
        })

    # Inputs: two feature levels (NCHW), batch=2.
    xs = [
        jax.random.normal(keys[4 * nl + 0], (2, ch[0], 16, 16), dtype=jnp.float32),
        jax.random.normal(keys[4 * nl + 1], (2, ch[1], 8, 8), dtype=jnp.float32),
    ]

    z_cat, x_outs = idetect_forward(xs, params, anchors, strides, na, no)
    jax.block_until_ready(z_cat)
    for xo in x_outs:
        jax.block_until_ready(xo)

    # Correctness check against the pure-JAX f32 reference (bf16 matmul
    # operands / bf16 raw storage in the kernel -> loosened tolerance).
    z_refs, x_refs = [], []
    for i, x in enumerate(xs):
        p = params[i]
        r5, zr = reference_level(x, p["ia"], p["w"], p["b"], p["im"],
                                 anchors[i], strides[i], na, no)
        x_refs.append(r5)
        z_refs.append(zr)
    z_ref = jnp.concatenate(z_refs, axis=1)

    assert z_cat.shape == z_ref.shape
    assert all(a.shape == b.shape for a, b in zip(x_outs, x_refs))
    assert jnp.allclose(z_cat, z_ref, atol=3e-2, rtol=3e-2)
    assert all(jnp.allclose(a, b, atol=3e-2, rtol=3e-2)
               for a, b in zip(x_outs, x_refs))

    print("KERNEL_OK")
</pallas_src>

<mosaic_0001>
module attributes {stable_mosaic.version = 11 : i64} {
  func.func @_idetect_level_kernel(%arg0: i32, %arg1: i32, %arg2: memref<1x8x256xf32, #tpu.memory_space<vmem>>, %arg3: memref<16x8xbf16, #tpu.memory_space<vmem>>, %arg4: memref<16x8xf32, #tpu.memory_space<vmem>>, %arg5: memref<1x16x256xbf16, #tpu.memory_space<vmem>>, %arg6: memref<1x16x256xf32, #tpu.memory_space<vmem>>) attributes {dimension_semantics = [#tpu.dimension_semantics<parallel>, #tpu.dimension_semantics<parallel>], iteration_bounds = array<i64: 2, 1>, scalar_prefetch = 0 : i64, scratch_operands = 0 : i64, tpu.core_type = #tpu.core_type<tc>, window_params = [{transform_indices = @transform_0, window_bounds = array<i64: 1, 8, 256>}, {pipeline_mode = #tpu.pipeline_mode<synchronous>, transform_indices = @transform_1, window_bounds = array<i64: 16, 8>}, {pipeline_mode = #tpu.pipeline_mode<synchronous>, transform_indices = @transform_2, window_bounds = array<i64: 16, 8>}, {transform_indices = @transform_3, window_bounds = array<i64: 1, 16, 256>}, {transform_indices = @transform_4, window_bounds = array<i64: 1, 16, 256>}]} {
    %c0 = arith.constant 0 : index
    %c0_0 = arith.constant 0 : index
    %c0_1 = arith.constant 0 : index
    %0 = vector.load %arg2[%c0, %c0_0, %c0_1] : memref<1x8x256xf32, #tpu.memory_space<vmem>>, vector<1x8x256xf32>
    %1 = vector.shape_cast %0 : vector<1x8x256xf32> to vector<8x256xf32>
    %2 = arith.truncf %1 : vector<8x256xf32> to vector<8x256xbf16>
    %c0_2 = arith.constant 0 : index
    %c0_3 = arith.constant 0 : index
    %3 = vector.load %arg3[%c0_2, %c0_3] : memref<16x8xbf16, #tpu.memory_space<vmem>>, vector<16x8xbf16>
    %cst = arith.constant dense<0.000000e+00> : vector<16x256xf32>
    %4 = tpu.matmul %3, %2, %cst {dimension_numbers = #tpu.dot_dimension_numbers<[1], [0], [0], [1], [0, 0, 1, 1], [], []>} : vector<16x8xbf16>, vector<8x256xbf16>, vector<16x256xf32> -> vector<16x256xf32>
    %c0_4 = arith.constant 0 : index
    %c0_5 = arith.constant 0 : index
    %5 = vector.load %arg4[%c0_4, %c0_5] : memref<16x8xf32, #tpu.memory_space<vmem>>, vector<16x8xf32>
    %6 = vector.extract_strided_slice %5 {offsets = [0, 0], sizes = [16, 1], strides = [1, 1]} : vector<16x8xf32> to vector<16x1xf32>
    %7 = vector.extract_strided_slice %5 {offsets = [0, 1], sizes = [16, 1], strides = [1, 1]} : vector<16x8xf32> to vector<16x1xf32>
    %8 = vector.extract_strided_slice %5 {offsets = [0, 2], sizes = [16, 1], strides = [1, 1]} : vector<16x8xf32> to vector<16x1xf32>
    %9 = vector.extract_strided_slice %5 {offsets = [0, 3], sizes = [16, 1], strides = [1, 1]} : vector<16x8xf32> to vector<16x1xf32>
    %10 = vector.extract_strided_slice %5 {offsets = [0, 4], sizes = [16, 1], strides = [1, 1]} : vector<16x8xf32> to vector<16x1xf32>
    %11 = vector.extract_strided_slice %5 {offsets = [0, 5], sizes = [16, 1], strides = [1, 1]} : vector<16x8xf32> to vector<16x1xf32>
    %12 = vector.extract_strided_slice %5 {offsets = [0, 6], sizes = [16, 1], strides = [1, 1]} : vector<16x8xf32> to vector<16x1xf32>
    %13 = vector.broadcast %6 : vector<16x1xf32> to vector<16x256xf32>
    %14 = arith.mulf %4, %13 : vector<16x256xf32>
    %15 = vector.broadcast %7 : vector<16x1xf32> to vector<16x256xf32>
    %16 = arith.addf %14, %15 : vector<16x256xf32>
    %17 = arith.truncf %16 : vector<16x256xf32> to vector<16x256xbf16>
    %c0_6 = arith.constant 0 : index
    %c0_7 = arith.constant 0 : index
    %c0_8 = arith.constant 0 : index
    %18 = vector.load %arg5[%c0_6, %c0_7, %c0_8] : memref<1x16x256xbf16, #tpu.memory_space<vmem>>, vector<1x16x256xbf16>
    %19 = vector.shape_cast %18 : vector<1x16x256xbf16> to vector<16x256xbf16>
    %20 = vector.shape_cast %17 : vector<16x256xbf16> to vector<1x16x256xbf16>
    tpu.vector_store %arg5[%c0_6, %c0_7, %c0_8], %20 {strides = array<i32>} : memref<1x16x256xbf16, #tpu.memory_space<vmem>>, vector<1x16x256xbf16>,
    %cst_9 = arith.constant 0.000000e+00 : f32
    %21 = vector.broadcast %cst_9 : f32 to vector<16x256xf32>
    %22 = arith.subf %21, %16 : vector<16x256xf32>
    %23 = math.exp %22 : vector<16x256xf32>
    %cst_10 = arith.constant 1.000000e+00 : f32
    %24 = vector.broadcast %cst_10 : f32 to vector<16x256xf32>
    %25 = arith.addf %24, %23 : vector<16x256xf32>
    %26 = tpu.reciprocal %25 {approx = true} : vector<16x256xf32> -> vector<16x256xf32>
    %27 = tpu.iota {dimensions = array<i32: 1>} : vector<1x256xi32>
    %28 = arith.sitofp %27 : vector<1x256xi32> to vector<1x256xf32>
    %c256_i32 = arith.constant 256 : i32
    %29 = arith.muli %arg1, %c256_i32 : i32
    %30 = arith.sitofp %29 : i32 to f32
    %31 = vector.broadcast %30 : f32 to vector<1x256xf32>
    %32 = arith.addf %28, %31 : vector<1x256xf32>
    %cst_11 = arith.constant 5.000000e-01 : f32
    %33 = vector.broadcast %cst_11 : f32 to vector<1x256xf32>
    %34 = arith.addf %32, %33 : vector<1x256xf32>
    %cst_12 = arith.constant 6.250000e-02 : f32
    %35 = vector.broadcast %cst_12 : f32 to vector<1x256xf32>
    %36 = arith.mulf %34, %35 : vector<1x256xf32>
    %37 = math.floor %36 : vector<1x256xf32>
    %cst_13 = arith.constant 1.600000e+01 : f32
    %38 = vector.broadcast %cst_13 : f32 to vector<1x256xf32>
    %39 = arith.mulf %37, %38 : vector<1x256xf32>
    %40 = arith.subf %32, %39 : vector<1x256xf32>
    %41 = vector.broadcast %8 : vector<16x1xf32> to vector<16x256xf32>
    %42 = arith.mulf %26, %41 : vector<16x256xf32>
    %43 = arith.mulf %26, %26 : vector<16x256xf32>
    %44 = vector.broadcast %9 : vector<16x1xf32> to vector<16x256xf32>
    %45 = arith.mulf %43, %44 : vector<16x256xf32>
    %46 = arith.addf %42, %45 : vector<16x256xf32>
    %47 = vector.broadcast %40 : vector<1x256xf32> to vector<16x256xf32>
    %48 = vector.broadcast %10 : vector<16x1xf32> to vector<16x256xf32>
    %49 = arith.mulf %47, %48 : vector<16x256xf32>
    %50 = arith.addf %46, %49 : vector<16x256xf32>
    %51 = vector.broadcast %37 : vector<1x256xf32> to vector<16x256xf32>
    %52 = vector.broadcast %11 : vector<16x1xf32> to vector<16x256xf32>
    %53 = arith.mulf %51, %52 : vector<16x256xf32>
    %54 = arith.addf %50, %53 : vector<16x256xf32>
    %55 = vector.broadcast %12 : vector<16x1xf32> to vector<16x256xf32>
    %56 = arith.addf %54, %55 : vector<16x256xf32>
    %c0_14 = arith.constant 0 : index
    %c0_15 = arith.constant 0 : index
    %c0_16 = arith.constant 0 : index
    %57 = vector.load %arg6[%c0_14, %c0_15, %c0_16] : memref<1x16x256xf32, #tpu.memory_space<vmem>>, vector<1x16x256xf32>
    %58 = vector.shape_cast %57 : vector<1x16x256xf32> to vector<16x256xf32>
    %59 = vector.shape_cast %56 : vector<16x256xf32> to vector<1x16x256xf32>
    tpu.vector_store %arg6[%c0_14, %c0_15, %c0_16], %59 {strides = array<i32>} : memref<1x16x256xf32, #tpu.memory_space<vmem>>, vector<1x16x256xf32>,
    return
  }
  func.func @transform_0(%arg0: i32, %arg1: i32) -> (i32, i32, i32) {
    %c0_i32 = arith.constant 0 : i32
    %c0_i32_0 = arith.constant 0 : i32
    return %arg0, %c0_i32, %arg1 : i32, i32, i32
  }
  func.func @transform_1(%arg0: i32, %arg1: i32) -> (i32, i32) {
    %c0_i32 = arith.constant 0 : i32
    %c0_i32_0 = arith.constant 0 : i32
    %c0_i32_1 = arith.constant 0 : i32
    return %c0_i32, %c0_i32_0 : i32, i32
  }
  func.func @transform_2(%arg0: i32, %arg1: i32) -> (i32, i32) {
    %c0_i32 = arith.constant 0 : i32
    %c0_i32_0 = arith.constant 0 : i32
    %c0_i32_1 = arith.constant 0 : i32
    return %c0_i32, %c0_i32_0 : i32, i32
  }
  func.func @transform_3(%arg0: i32, %arg1: i32) -> (i32, i32, i32) {
    %c0_i32 = arith.constant 0 : i32
    %c0_i32_0 = arith.constant 0 : i32
    return %arg0, %c0_i32, %arg1 : i32, i32, i32
  }
  func.func @transform_4(%arg0: i32, %arg1: i32) -> (i32, i32, i32) {
    %c0_i32 = arith.constant 0 : i32
    %c0_i32_0 = arith.constant 0 : i32
    return %arg0, %c0_i32, %arg1 : i32, i32, i32
  }
}

</mosaic_0001>

<bundles_post_ra>
// kernel: tpu_custom_call.1
= control target key start
LH: loop header
LB: loop body
LE: loop exit
PB: predicated region body
PF: predicated region fallthrough
CT: control target
= control target key end

     0   :  { %10 = vsyncpa [#allocation3], 0  ;;  %s1118_s0 = inlined_call_operand.hbm [shape: f32[2,8,256], index: 0, kind: input, shape index: {}]   ;;  %s1119_s1 = inlined_call_operand.vmem [shape: bf16[16,8], index: 1, kind: input, shape index: {}]   ;;  %s1120_s2 = inlined_call_operand.vmem [shape: f32[16,8], index: 2, kind: input, shape index: {}]   ;;  %s1121_s3 = inlined_call_operand.hbm [shape: bf16[2,16,256], index: 3, kind: output, shape index: {0}]   ;;  %s1122_s4 = inlined_call_operand.hbm [shape: f32[2,16,256], index: 4, kind: output, shape index: {1}]  }
   0x1   :  { %12 = vsyncpa [#allocation3 + $0x1], 0 }
   0x2   :  { %13 = vsyncpa [#allocation4], 0 }
   0x3   :  { %15 = vsyncpa [#allocation4 + $0x1], 0 }
   0x4   :  { %16 = vsyncpa [#allocation7], 0 }
   0x5   :  { %18 = vsyncpa [#allocation7 + $0x1], 0  ;;  %s935_s15 = smov 0   ;;  %s937_s16 = smov 0  }
   0x6   :  { %s939_s17 = smov 0   ;;  %s941_s18 = smov 0  }
   0x7   :  { %s943_s19 = smov 0   ;;  %s945_s20 = smov 0  }
   0x8 LB: > { %s618_s21 = sadd.s32 4294967295, %s897_s20   ;;  %s619_s22 = sadd.s32 4294967294, %s897_s20   ;;  %s897_s20 = sphi %s945_s20, %s24_s20   ;;  %s893_s19 = sphi %s943_s19, %s1131_s19   ;;  %s889_s18 = sphi %s941_s18, %s1130_s18   ;;  %s885_s17 = sphi %s939_s17, %s1129_s17   ;;  %s881_s16 = sphi %s937_s16, %s1128_s16   ;;  %s877_s15 = sphi %s935_s15, %s1127_s15  }
   0x9   : > { %s36_s23 = sadd.s32 1, %s893_s19  ;;  %s45_s24 = sadd.s32 1, %s885_s17 }
   0xa   : > { %p38_p0 = scmp.ge.s32.totalorder %s36_s23, 2  ;;  %p52_p1 = scmp.ne.s32.totalorder %s885_s17, %s881_s16 }
   0xb   : > { %p53_p2 = scmp.eq.s32.totalorder %s897_s20, 0  ;;  %p58_p3 = scmp.ne.s32.totalorder %s881_s16, %s877_s15 }
   0xc   : > { %s1133_s23 = smov (%p38_p0, %s36_s23), 0  ;;  %p59_p5 = scmp.eq.s32.totalorder %s618_s21, 0 }
   0xd   : > { %p976_p4 = por %p53_p2, %p52_p1  ;;  %s40_s26 = ssub.s32 %s893_s19, %s1133_s23 }
   0xe   : > { %p126_p6 = scmp.eq.s32.totalorder %s618_s21, 1  ;;  %p43_p7 = scmp.eq.s32.totalorder %s40_s26, 0 }
   0xf   : > { %p982_p8 = por %p59_p5, %p58_p3  ;;  %p132_p10 = scmp.eq.s32.totalorder %s619_s22, 1 }
  0x10   : > { %p986_p9 = por %p126_p6, %p52_p1  ;;  %p621_p12 = scmp.ge.s32.totalorder %s897_s20, 2 }
  0x11   : > { %s991_s29 = scalar_select %p43_p7, %s885_s17, %s45_s24  }
  0x12   : > { %p993_p11 = por %p132_p10, %p58_p3  ;;  %p664_p13 = scmp.lt.s32.totalorder %s897_s20, 2 }
  0x13   : > { %s186_s5 = sand.u32 1, %s885_s17   ;;  %s643_s7 = sshll.u32 %s893_s19, 4 }
  0x14   : > { %s622_s6 = sshll.u32 %s186_s5, 4  ;;  %s197_s10 = scalar_lea.hbm %s1118_s0, %s643_s7 }
  0x15   : > { %s190_s11 = scalar_lea.vmem [#allocation2], %s622_s6  ;;  %s199_s13 = sshll.u32 %s197_s10, 4  ;;  %s200_s13 = int_to_ptr.hbm [resolvable:$true] %s199_s13 }
  0x16   : > { %s201_s12 = sshll.u32 %s190_s11, 4  ;;  %p654_p0 = pnand %p664_p13, %p976_p4  ;;  %s202_s12 = int_to_ptr.vmem [resolvable:$true] %s201_s12 }
  0x17   : > { %p625_p1 = scmp.ge.s32.totalorder %s897_s20, 1  ;;  %p206_p2 = scmp.lt.s32.totalorder %s897_s20, 3 }
  0x18   : > { %s187_s14 = scalar_lea.sflag [#allocation3], %s186_s5 }
  0x19   : > { %656 = dma.hbm_to_vmem [thread:$0]  (!%p654_p0), %s200_s13, 256, %s202_s12, %s187_s14  }
  0x1a   : > { %p207_p3 = pnand %p625_p1, %p206_p2 }
  0x1b   : > { %s1009_s21 = sand.u32 (!%p207_p3), 1, %s881_s16  }
  0x1c   : > { %210 = sbr.rel (%p207_p3) target bundleno = 219 (0xdb), region = 32  ;;  %s626_s22 = sshll.u32 (!%p207_p3), %s1009_s21, 4 }
  0x1d   : > { %s213_s24 = scalar_lea.sflag (!%p207_p3), [#allocation3], %s1009_s21  ;;  %s216_s26 = scalar_lea.vmem (!%p207_p3), [#allocation2], %s626_s22 }
  0x21   : > { %864 = dma.done.wait (%p982_p8), %s213_s24, 256  }
  0x22   : > { %866 = vsyncadd (%p982_p8), %s213_s24, 4294967040  ;;  %v899_v0 = vmov 0   ;;  %v900_v1 = vmov 1   ;;  %v901_v2 = vmov 2   ;;  %v251_v3 = vld [vmem:[%s216_s26] sm:$0xff]  ;;  %vm266_vm0 = vcmask 1043456  }
  0x23   : > { %725 = vset.pattern.permute.xlu0 %v899_v0  ;;  %726 = vset.pattern.permute.xlu1 %v900_v1  ;;  %v252_v4 = vld [vmem:[%s216_s26 + $0x8] sm:$0xff]  ;;  %v253_v5 = vpack.c.bf16 %v251_v3, %v251_v3  ;;  %v301_v7 = vld [vmem:[%s1120_s2] sm:$0xff]  ;;  %vm262_vm1 = vcmask 64512   ;;  %v902_v12 = vmov 3   ;;  %v903_v13 = vmov 4   ;;  %s645_s9 = sshll.u32 %s889_s18, 4 }
  0x24   : > { %727 = vset.pattern.permute.xlu2 %v901_v2  ;;  %v254_v6 = vpack.c.bf16 %v252_v4, %v252_v4  ;;  %305 = vperm.xlu0 %725, %v301_v7   ;;  %v644_v10 = vld [vmem:[%s1119_s1] sm:$0xff]  ;;  %v302_v11 = vld [vmem:[%s1120_s2 + $0x8] sm:$0xff]  ;;  %v904_v14 = vmov 5   ;;  %v905_v15 = vmov 6   ;;  %v353_v17 = vlaneseq  ;;  %s472_s12 = scalar_lea.hbm %s1121_s3, %s645_s9  ;;  %s239_s13 = scalar_lea.vmem [#allocation5], %s626_s22 }
  0x25   : > { %318 = vperm.xlu1 %726, %v301_v7   ;;  %v268_v8 = vsel %vm266_vm0, %v253_v5, 0  ;;  %374 = vperm.xlu2 %727, %v301_v7   ;;  %s473_s14 = sshll.u32 %s239_s13, 4  ;;  %s475_s24 = sshll.u32 %s472_s12, 4  ;;  %s1049_s14 = int_to_ptr.vmem [resolvable:$true] %s473_s14  ;;  %s1053_s24 = int_to_ptr.hbm [resolvable:$true] %s475_s24 }
  0x26   : > { %v271_v9 = vsel %vm266_vm0, %v254_v6, 0  ;;  %280 = vmatpush.bf16.msra.mxu0 %v268_v8  ;;  %v1030_v20 = vand.u32 127, %v353_v17  ;;  %s454_s22 = scalar_lea.sflag [#allocation4], %s1009_s21  ;;  %s797_s26 = sshra.s32 %s1053_s24, 4  ;;  %s798_s26 = int_to_ptr.hbm [resolvable:$true] %s797_s26 }
  0x27   : > { %294 = vmatpush.bf16.msra.mxu1 %v271_v9  ;;  %s799_s25 = scalar_lea.hbm %s798_s26, 16  ;;  %s803_s6 = scalar_lea.hbm %s1121_s3, 32 }
  0x28   : > { %v1033_v25 = vadd.s32 128, %v1030_v20  ;;  %v356_v32 = vcvt.s32.f32 %v1030_v20  ;;  %p800_p4 = scmp.ne.s32.totalorder %s798_s26, %s799_s25  ;;  %p804_p7 = scmp.lt.s32.totalorder %s798_s26, %s1121_s3 }
  0x29   : > { %633 = vmatmul.msk.bf16.vlgmr.msra.gmra.mxu0 %vm262_vm1, %v644_v10  ;;  %p805_p8 = scmp.lt.s32.totalorder %s803_s6, %s799_s25 }
  0x2a   : > { %634 = vmatmul.msk.bf16.vlgmr.msra.gmra.mxu1 %vm262_vm1, %v644_v10  ;;  %v357_v33 = vcvt.s32.f32 %v1033_v25  ;;  %v363_v42 = vadd.f32 0.5, %v356_v32  ;;  %p801_p5 = pnand %p800_p4, %p986_p9 }
  0x2b   : > { %p806_p10 = por %p805_p8, %p804_p7 }
  0x2c   : > { %310 = vperm.xlu0 %725, %v302_v11   ;;  %v364_v43 = vadd.f32 0.5, %v357_v33  ;;  %v365_v50 = vmul.f32 0.0625, %v363_v42  ;;  %p802_p6 = pneg %p801_p5 }
  0x2d   : > { %322 = vperm.xlu1 %726, %v302_v11   ;;  %378 = vperm.xlu2 %727, %v302_v11  }
  0x2e   : > { %v366_v51 = vmul.f32 0.0625, %v364_v43  ;;  %p807_p13 = pnand %p806_p10, %p802_p6 }
  0x34   : > { %728 = vset.pattern.permute.xlu0 %v902_v12 }
  0x35   : > { %729 = vset.pattern.permute.xlu1 %v902_v12  ;;  %390 = vperm.xlu0 %728, %v301_v7  }
  0x36   : > { %394 = vperm.xlu1 %729, %v302_v11   ;;  %730 = vset.pattern.permute.xlu2 %v903_v13 }
  0x37   : > { %406 = vperm.xlu2 %730, %v301_v7  }
  0x3d   : > { %733 = vset.pattern.permute.xlu0 %v904_v14 }
  0x3e   : > { %731 = vset.pattern.permute.xlu1 %v903_v13  ;;  %426 = vperm.xlu0 %733, %v302_v11  }
  0x3f   : > { %410 = vperm.xlu1 %731, %v302_v11   ;;  %732 = vset.pattern.permute.xlu2 %v904_v14 }
  0x40   : > { %422 = vperm.xlu2 %732, %v301_v7  }
  0x46   : > { %736 = vset.pattern.permute.xlu0 %v905_v15 }
  0x47   : > { %734 = vset.pattern.permute.xlu1 %v905_v15 }
  0x48   : > { %438 = vperm.xlu1 %734, %v301_v7   ;;  %735 = vset.pattern.permute.xlu2 %v905_v15 }
  0x49   : > { %442 = vperm.xlu2 %735, %v302_v11  }
  0x7f   : > { %v1028_v19 = vpop.permute.xlu2 %374 }
  0x87   : > { %v1043_v37 = vpop.permute.xlu2 %378 }
  0x91   : > { %v407_v57 = vpop.permute.xlu2 %406 }
  0x96   : > { %v306_v18 = vpop.permute.xlu0 %305 }
  0x97   : > { %v319_v16 = vpop.permute.xlu1 %318 }
  0x9e   : > { %v311_v34 = vpop.permute.xlu0 %310 }
  0x9f   : > { %v323_v28 = vpop.permute.xlu1 %322 }
  0xa6   : > { %v282_v21 = vpop.f32.mrf.mxu0 }
  0xa7   : > { %v296_v22 = vpop.f32.mrf.mxu1  ;;  %v313_v23 = vmul.f32 %v306_v18, %v282_v21 }
  0xa8   : > { %v314_v24 = vmul.f32 %v306_v18, %v296_v22  ;;  %v1051_v46 = vpop.permute.xlu1 %394 }
  0xa9   : > { %v325_v26 = vadd.f32 %v319_v16, %v313_v23 }
  0xaa   : > { %v326_v27 = vadd.f32 %v319_v16, %v314_v24 }
  0xab   : > { %v333_v29 = vsub.f32 0.0, %v325_v26 }
  0xac   : > { %v329_v30 = vpack.c.bf16 %v326_v27, %v325_v26  ;;  %v334_v31 = vsub.f32 0.0, %v326_v27 }
  0xad   : > { %v337_v35 = vmul.f32 1.442695, %v333_v29 }
  0xae   : > { %331 = vst [vmem:[%s239_s13] sm:$0xff] %v329_v30  ;;  %v339_v36 = vmul.f32 1.442695, %v334_v31  ;;  %v284_v38 = vpop.f32.mrf.mxu0 }
  0xaf   : > { %v298_v39 = vpop.f32.mrf.mxu1  ;;  %737 = vpow2.f32 %v337_v35  ;;  %v315_v40 = vmul.f32 %v311_v34, %v284_v38 }
  0xb0   : > { %v316_v41 = vmul.f32 %v311_v34, %v298_v39  ;;  %739 = vpow2.f32 %v339_v36 }
  0xb1   : > { %v327_v44 = vadd.f32 %v323_v28, %v315_v40 }
  0xb2   : > { %v328_v45 = vadd.f32 %v323_v28, %v316_v41 }
  0xb3   : > { %v335_v47 = vsub.f32 0.0, %v327_v44 }
  0xb4   : > { %v330_v48 = vpack.c.bf16 %v328_v45, %v327_v44  ;;  %v336_v49 = vsub.f32 0.0, %v328_v45 }
  0xb5   : > { %v738_v52 = vpop.eup %737  ;;  %v341_v53 = vmul.f32 1.442695, %v335_v47 }
  0xb6   : > { %332 = vst [vmem:[%s239_s13 + $0x8] sm:$0xff] %v330_v48  ;;  %v740_v54 = vpop.eup %739  ;;  %v345_v55 = vadd.f32 1.0, %v738_v52  ;;  %v343_v56 = vmul.f32 1.442695, %v336_v49 }
  0xb7   : > { %810 = shalt.err (!%p807_p13)
}
  0xb8   : > { %s906_s9 = smov 128   ;;  %s907_s10 = smov 8   ;;  %v346_v58 = vadd.f32 1.0, %v740_v54  ;;  %741 = vpow2.f32 %v341_v53  ;;  %v367_v59 = vfloor.f32 %v365_v50  ;;  %v368_v60 = vfloor.f32 %v366_v51  ;;  %v411_v63 = vpop.permute.xlu1 %410  ;;  %v391_v3 = vpop.permute.xlu0 %390 }
  0xb9   : > { %649 = dma.vmem_to_hbm [thread:$0]  (%p986_p9), %s1049_s14, 256, %s1053_s24, %s454_s22, %s906_s9, %s906_s9, %s907_s10   ;;  %743 = vrcp.f32 %v345_v55  ;;  %v423_v10 = vpop.permute.xlu2 %422 }
  0xba   : > { %745 = vrcp.f32 %v346_v58  ;;  %v369_v61 = vmul.f32 16.0, %v367_v59  ;;  %v370_v62 = vmul.f32 16.0, %v368_v60  ;;  %v429_v18 = vmul.f32 %v423_v10, %v367_v59  ;;  %s628_s11 = sshll.u32 %s1009_s21, 5  ;;  %s646_s12 = sshll.u32 %s889_s18, 5 }
  0xbb   : > { %747 = vpow2.f32 %v343_v56  ;;  %v430_v22 = vmul.f32 %v423_v10, %v368_v60  ;;  %s246_s13 = scalar_lea.vmem [#allocation6], %s628_s11  ;;  %s491_s22 = scalar_lea.hbm %s1122_s4, %s646_s12 }
  0xbc   : > { %v371_v5 = vsub.f32 %v356_v32, %v369_v61  ;;  %v372_v8 = vsub.f32 %v357_v33, %v370_v62  ;;  %s492_s18 = sshll.u32 %s246_s13, 4  ;;  %s494_s26 = sshll.u32 %s491_s22, 4  ;;  %s493_s18 = int_to_ptr.vmem [resolvable:$true] %s492_s18  ;;  %s495_s26 = int_to_ptr.hbm [resolvable:$true] %s494_s26 }
  0xbd   : > { %s459_s25 = scalar_lea.sflag [#allocation7], %s1009_s21  ;;  %s825_s5 = sshra.s32 %s495_s26, 4  ;;  %s826_s5 = int_to_ptr.hbm [resolvable:$true] %s825_s5 }
  0xbe   : > { %v742_v0 = vpop.eup %741  ;;  %v413_v16 = vmul.f32 %v407_v57, %v371_v5  ;;  %v414_v20 = vmul.f32 %v407_v57, %v372_v8  ;;  %v415_v38 = vmul.f32 %v411_v63, %v371_v5  ;;  %v416_v44 = vmul.f32 %v411_v63, %v372_v8  ;;  %s827_s27 = scalar_lea.hbm %s826_s5, 32  ;;  %s831_s8 = scalar_lea.hbm %s1122_s4, 64 }
  0xbf   : > { %v744_v1 = vpop.eup %743  ;;  %v347_v2 = vadd.f32 1.0, %v742_v0  ;;  %p828_p0 = scmp.ne.s32.totalorder %s826_s5, %s827_s27  ;;  %p832_p3 = scmp.lt.s32.totalorder %s826_s5, %s1122_s4 }
  0xc0   : > { %v746_v4 = vpop.eup %745  ;;  %v385_v6 = vmul.f32 %v744_v1, %v744_v1  ;;  %v381_v12 = vmul.f32 %v744_v1, %v1028_v19  ;;  %v439_v25 = vpop.permute.xlu1 %438  ;;  %p833_p4 = scmp.lt.s32.totalorder %s831_s8, %s827_s27 }
  0xc1   : > { %v748_v7 = vpop.eup %747  ;;  %749 = vrcp.f32 %v347_v2  ;;  %v386_v9 = vmul.f32 %v746_v4, %v746_v4  ;;  %v382_v14 = vmul.f32 %v746_v4, %v1028_v19  ;;  %v427_v30 = vpop.permute.xlu0 %426  ;;  %p829_p1 = pnand %p828_p0, %p986_p9 }
  0xc2   : > { %v348_v11 = vadd.f32 1.0, %v748_v7  ;;  %v397_v13 = vmul.f32 %v391_v3, %v385_v6  ;;  %v431_v39 = vmul.f32 %v427_v30, %v367_v59  ;;  %v432_v45 = vmul.f32 %v427_v30, %v368_v60  ;;  %v443_v47 = vpop.permute.xlu2 %442  ;;  %p834_p5 = por %p833_p4, %p832_p3 }
  0xc3   : > { %v398_v15 = vmul.f32 %v391_v3, %v386_v9  ;;  %p830_p2 = pneg %p829_p1 }
  0xc4   : > { %751 = vrcp.f32 %v348_v11  ;;  %v401_v17 = vadd.f32 %v397_v13, %v381_v12 }
  0xc5   : > { %v402_v21 = vadd.f32 %v398_v15, %v382_v14  ;;  %p835_p6 = pnand %p834_p5, %p830_p2 }
  0xc6   : > { %v417_v23 = vadd.f32 %v413_v16, %v401_v17 }
  0xc7   : > { %v750_v24 = vpop.eup %749  ;;  %v418_v26 = vadd.f32 %v414_v20, %v402_v21 }
  0xc8   : > { %v387_v27 = vmul.f32 %v750_v24, %v750_v24  ;;  %v433_v28 = vadd.f32 %v429_v18, %v417_v23  ;;  %v383_v19 = vmul.f32 %v750_v24, %v1043_v37 }
  0xc9   : > { %v434_v29 = vadd.f32 %v430_v22, %v418_v26 }
  0xca   : > { %v752_v31 = vpop.eup %751  ;;  %v399_v32 = vmul.f32 %v1051_v46, %v387_v27  ;;  %v445_v33 = vadd.f32 %v439_v25, %v433_v28 }
  0xcb   : > { %v388_v34 = vmul.f32 %v752_v31, %v752_v31  ;;  %v446_v35 = vadd.f32 %v439_v25, %v434_v29  ;;  %v384_v40 = vmul.f32 %v752_v31, %v1043_v37 }
  0xcc   : > { %v403_v36 = vadd.f32 %v399_v32, %v383_v19  ;;  %449 = vst [vmem:[%s246_s13] sm:$0xff] %v445_v33 }
  0xcd   : > { %v400_v41 = vmul.f32 %v1051_v46, %v388_v34  ;;  %450 = vst [vmem:[%s246_s13 + $0x8] sm:$0xff] %v446_v35 }
  0xce   : > { %v419_v42 = vadd.f32 %v415_v38, %v403_v36 }
  0xcf   : > { %v404_v43 = vadd.f32 %v400_v41, %v384_v40 }
  0xd0   : > { %v435_v48 = vadd.f32 %v431_v39, %v419_v42 }
  0xd1   : > { %v420_v49 = vadd.f32 %v416_v44, %v404_v43 }
  0xd2   : > { %v447_v50 = vadd.f32 %v443_v47, %v435_v48 }
  0xd3   : > { %v436_v37 = vadd.f32 %v432_v45, %v420_v49 }
  0xd4   : > { %451 = vst [vmem:[%s246_s13 + $0x10] sm:$0xff] %v447_v50 }
  0xd5   : > { %v448_v46 = vadd.f32 %v443_v47, %v436_v37 }
  0xd7   : > { %452 = vst [vmem:[%s246_s13 + $0x18] sm:$0xff] %v448_v46 }
  0xd8   : > { %838 = shalt.err (!%p835_p6)
}
  0xd9   : > { %s908_s21 = smov 256   ;;  %s909_s11 = smov 16  }
  0xda   : > { %650 = dma.vmem_to_hbm [thread:$0]  (%p986_p9), %s493_s18, 512, %s495_s26, %s459_s25, %s908_s21, %s908_s21, %s909_s11  }
  0xdb PF: > { %s509_s12 = sand.u32 1, %s877_s15   ;;  %p658_p7 = pnand %p621_p12, %p993_p11 }
  0xdc   : > { %s510_s13 = scalar_lea.sflag [#allocation4], %s509_s12 }
  0xdd   : > { %p659_p8 = pneg %p658_p7 }
  0xdf   : > { %868 = dma.done.wait (%p659_p8), %s510_s13, 256  }
  0xe0   : > { %870 = vsyncadd (%p659_p8), %s510_s13, 4294967040  ;;  %s520_s14 = scalar_lea.sflag [#allocation7], %s509_s12 }
  0xe1   : > { %872 = dma.done.wait (%p659_p8), %s520_s14, 512  }
  0xe2   : > { %874 = vsyncadd (%p659_p8), %s520_s14, 4294966784  ;;  %s24_s20 = sadd.s32 1, %s897_s20   ;;  %s1127_s15 = smov %s881_s16 }
  0xe3   : > { %p21_p10 = scmp.ge.s32.totalorder %s24_s20, 4   ;;  %s1128_s16 = smov %s885_s17 }
  0xe4   : > { %s1129_s17 = smov %s991_s29  ;;  %s1130_s18 = smov %s893_s19 }
  0xe5   : > { %s1131_s19 = smov %s1133_s23  ;;  %23 = sbr.rel (!%p21_p10) target bundleno = 8 (0x8), region = 94 }
  0xea   :  { %526 = vsyncpa [#allocation3], 1 }
  0xeb   :  { %528 = vsyncpa [#allocation3 + $0x1], 1 }
  0xec   :  { %529 = vsyncpa [#allocation4], 1 }
  0xed   :  { %531 = vsyncpa [#allocation4 + $0x1], 1 }
  0xee   :  { %532 = vsyncpa [#allocation7], 1 }
  0xef   :  { %534 = vsyncpa [#allocation7 + $0x1], 1 }

</bundles_post_ra>
